<compile_context>
chip_gen: v7x
topology: tpu7x:2x2x1
jax: 0.10.0
libtpu: 0.0.40
codegen_flags: <defaults>
</compile_context>

<pallas_src>
import jax
import jax.numpy as jnp
from jax.experimental import pallas as pl
from jax.experimental.pallas import tpu as pltpu

MID = 300


def _round_up(x, m):
    return ((x + m - 1) // m) * m


def mlp_kernel(x_ref, w1_ref, b1_ref, w2_ref, b2_ref, w3_ref, b3_ref, o_ref):
    x = x_ref[...]                       # (TM, 2) f32
    w1 = w1_ref[...]                     # (2, MID)

    # Hidden layer 1: Linear(2, MID) + ReLU, on the VPU (K=2 -> skip the MXU).
    h = x[:, 0:1] * w1[0:1, :] + x[:, 1:2] * w1[1:2, :] + b1_ref[...]
    h = jnp.maximum(h, 0.0)

    # Hidden layer 2: Linear(MID, MID) + ReLU -- the only MXU matmul.
    w2 = w2_ref[...]
    if w2.dtype == jnp.bfloat16:         # static (trace-time) dtype check
        h = h.astype(jnp.bfloat16)
    h = jnp.dot(h, w2, preferred_element_type=jnp.float32)
    h = jnp.maximum(h + b2_ref[...], 0.0)

    # Output layer: Linear(MID, 1) as VPU multiply + lane (XLU) reduction.
    out = jnp.sum(h * w3_ref[...], axis=-1, keepdims=True) + b3_ref[0]
    o_ref[...] = out.astype(o_ref.dtype)


def net_forward(x, params, *, tm=256, use_bf16=False):
    """x: (N, 2) float32.  params: dict of weights/biases in (in, out) layout."""
    n = x.shape[0]
    mid = params["w2"].shape[0]

    # Tile size: multiple of 8 sublanes; shrink for tiny batches, pad ragged N.
    tm = max(8, min(tm, _round_up(n, 8)))
    n_pad = _round_up(n, tm)
    if n_pad != n:
        x = jnp.pad(x, ((0, n_pad - n), (0, 0)))

    w1 = params["w1"]                                        # (2, mid)
    b1 = params["b1"]                                        # (1, mid)
    w2 = params["w2"].astype(jnp.bfloat16) if use_bf16 else params["w2"]
    b2 = params["b2"]                                        # (1, mid)
    w3 = params["w3"].reshape(1, mid)                        # row for VPU path
    b3 = params["b3"].reshape(1)                             # scalar -> SMEM

    const = lambda i: (0, 0)   # resident: same block every grid step
    grid_spec = pltpu.PrefetchScalarGridSpec(
        num_scalar_prefetch=0,
        grid=(n_pad // tm,),
        in_specs=[
            pl.BlockSpec((tm, 2), lambda i: (i, 0)),              # x tile
            pl.BlockSpec((2, mid), const),                        # w1
            pl.BlockSpec((1, mid), const),                        # b1
            pl.BlockSpec((mid, mid), const),                      # w2
            pl.BlockSpec((1, mid), const),                        # b2
            pl.BlockSpec((1, mid), const),                        # w3 (row)
            pl.BlockSpec(memory_space=pltpu.MemorySpace.SMEM),    # b3 scalar
        ],
        out_specs=pl.BlockSpec((tm, 1), lambda i: (i, 0)),
    )
    out = pl.pallas_call(
        mlp_kernel,
        out_shape=jax.ShapeDtypeStruct((n_pad, 1), jnp.float32),
        grid_spec=grid_spec,
        compiler_params=pltpu.CompilerParams(
            dimension_semantics=("parallel",)),
    )(x, w1, b1, w2, b2, w3, b3)
    return out[:n]


def init_params(key, mid=MID):
    """Deterministic init mimicking nn.Linear's U(-1/sqrt(fan_in), 1/sqrt(fan_in))."""
    def linear(key, fan_in, fan_out):
        kw, kb = jax.random.split(key)
        bound = 1.0 / jnp.sqrt(fan_in)
        w = jax.random.uniform(kw, (fan_in, fan_out), jnp.float32, -bound, bound)
        b = jax.random.uniform(kb, (1, fan_out), jnp.float32, -bound, bound)
        return w, b

    k1, k2, k3 = jax.random.split(key, 3)
    w1, b1 = linear(k1, 2, mid)
    w2, b2 = linear(k2, mid, mid)
    w3, b3 = linear(k3, mid, 1)
    return {"w1": w1, "b1": b1, "w2": w2, "b2": b2, "w3": w3, "b3": b3}


def net_forward_ref(x, p):
    h = jnp.maximum(x @ p["w1"] + p["b1"], 0.0)
    h = jnp.maximum(h @ p["w2"] + p["b2"], 0.0)
    return h @ p["w3"] + p["b3"]


if __name__ == "__main__":
    key = jax.random.PRNGKey(0)
    kx, kx2, kp = jax.random.split(key, 3)
    params = init_params(kp, mid=MID)

    # Ragged batch with a small tile -> exercises multi-step grid + padding.
    batch = 37
    x = jax.random.normal(kx, (batch, 2), dtype=jnp.float32)
    out = jax.block_until_ready(net_forward(x, params, tm=16))
    ref = net_forward_ref(x, params)
    assert out.shape == (batch, 1), out.shape
    assert jnp.allclose(out, ref, atol=1e-4, rtol=1e-4), "mismatch vs JAX reference"

    # Small batch with the default tile (single grid step).
    batch2 = 8
    x2 = jax.random.normal(kx2, (batch2, 2), dtype=jnp.float32)
    out2 = jax.block_until_ready(net_forward(x2, params))
    ref2 = net_forward_ref(x2, params)
    assert out2.shape == (batch2, 1), out2.shape
    assert jnp.allclose(out2, ref2, atol=1e-4, rtol=1e-4), "mismatch vs JAX reference"

    print("KERNEL_OK")
</pallas_src>

<mosaic_0001>
module attributes {stable_mosaic.version = 11 : i64} {
  func.func @mlp_kernel(%arg0: i32, %arg1: memref<16x2xf32, #tpu.memory_space<vmem>>, %arg2: memref<2x300xf32, #tpu.memory_space<vmem>>, %arg3: memref<1x300xf32, #tpu.memory_space<vmem>>, %arg4: memref<300x300xf32, #tpu.memory_space<vmem>>, %arg5: memref<1x300xf32, #tpu.memory_space<vmem>>, %arg6: memref<1x300xf32, #tpu.memory_space<vmem>>, %arg7: memref<1xf32, #tpu.memory_space<smem>>, %arg8: memref<16x1xf32, #tpu.memory_space<vmem>>) attributes {dimension_semantics = [#tpu.dimension_semantics<parallel>], iteration_bounds = array<i64: 3>, scalar_prefetch = 0 : i64, scratch_operands = 0 : i64, tpu.core_type = #tpu.core_type<tc>, window_params = [{transform_indices = @transform_0, window_bounds = array<i64: 16, 2>}, {pipeline_mode = #tpu.pipeline_mode<synchronous>, transform_indices = @transform_1, window_bounds = array<i64: 2, 300>}, {pipeline_mode = #tpu.pipeline_mode<synchronous>, transform_indices = @transform_2, window_bounds = array<i64: 1, 300>}, {pipeline_mode = #tpu.pipeline_mode<synchronous>, transform_indices = @transform_3, window_bounds = array<i64: 300, 300>}, {pipeline_mode = #tpu.pipeline_mode<synchronous>, transform_indices = @transform_4, window_bounds = array<i64: 1, 300>}, {pipeline_mode = #tpu.pipeline_mode<synchronous>, transform_indices = @transform_5, window_bounds = array<i64: 1, 300>}, {transform_indices = @transform_6, window_bounds = array<i64: 1>}, {transform_indices = @transform_7, window_bounds = array<i64: 16, 1>}]} {
    %c0 = arith.constant 0 : index
    %c0_0 = arith.constant 0 : index
    %0 = vector.load %arg1[%c0, %c0_0] : memref<16x2xf32, #tpu.memory_space<vmem>>, vector<16x2xf32>
    %c0_1 = arith.constant 0 : index
    %c0_2 = arith.constant 0 : index
    %1 = vector.load %arg2[%c0_1, %c0_2] : memref<2x300xf32, #tpu.memory_space<vmem>>, vector<2x300xf32>
    %2 = vector.extract_strided_slice %0 {offsets = [0, 0], sizes = [16, 1], strides = [1, 1]} : vector<16x2xf32> to vector<16x1xf32>
    %3 = vector.extract_strided_slice %1 {offsets = [0, 0], sizes = [1, 300], strides = [1, 1]} : vector<2x300xf32> to vector<1x300xf32>
    %4 = vector.broadcast %2 : vector<16x1xf32> to vector<16x300xf32>
    %5 = vector.broadcast %3 : vector<1x300xf32> to vector<16x300xf32>
    %6 = arith.mulf %4, %5 : vector<16x300xf32>
    %7 = vector.extract_strided_slice %0 {offsets = [0, 1], sizes = [16, 1], strides = [1, 1]} : vector<16x2xf32> to vector<16x1xf32>
    %8 = vector.extract_strided_slice %1 {offsets = [1, 0], sizes = [1, 300], strides = [1, 1]} : vector<2x300xf32> to vector<1x300xf32>
    %9 = vector.broadcast %7 : vector<16x1xf32> to vector<16x300xf32>
    %10 = vector.broadcast %8 : vector<1x300xf32> to vector<16x300xf32>
    %11 = arith.mulf %9, %10 : vector<16x300xf32>
    %12 = arith.addf %6, %11 : vector<16x300xf32>
    %c0_3 = arith.constant 0 : index
    %c0_4 = arith.constant 0 : index
    %13 = vector.load %arg3[%c0_3, %c0_4] : memref<1x300xf32, #tpu.memory_space<vmem>>, vector<1x300xf32>
    %14 = vector.broadcast %13 : vector<1x300xf32> to vector<16x300xf32>
    %15 = arith.addf %12, %14 : vector<16x300xf32>
    %cst = arith.constant 0.000000e+00 : f32
    %16 = vector.broadcast %cst : f32 to vector<16x300xf32>
    %17 = arith.maximumf %15, %16 : vector<16x300xf32>
    %c0_5 = arith.constant 0 : index
    %c0_6 = arith.constant 0 : index
    %18 = vector.load %arg4[%c0_5, %c0_6] : memref<300x300xf32, #tpu.memory_space<vmem>>, vector<300x300xf32>
    %cst_7 = arith.constant dense<0.000000e+00> : vector<16x300xf32>
    %19 = tpu.matmul %17, %18, %cst_7 {dimension_numbers = #tpu.dot_dimension_numbers<[1], [0], [0], [1], [0, 0, 1, 1], [], []>} : vector<16x300xf32>, vector<300x300xf32>, vector<16x300xf32> -> vector<16x300xf32>
    %c0_8 = arith.constant 0 : index
    %c0_9 = arith.constant 0 : index
    %20 = vector.load %arg5[%c0_8, %c0_9] : memref<1x300xf32, #tpu.memory_space<vmem>>, vector<1x300xf32>
    %21 = vector.broadcast %20 : vector<1x300xf32> to vector<16x300xf32>
    %22 = arith.addf %19, %21 : vector<16x300xf32>
    %cst_10 = arith.constant 0.000000e+00 : f32
    %23 = vector.broadcast %cst_10 : f32 to vector<16x300xf32>
    %24 = arith.maximumf %22, %23 : vector<16x300xf32>
    %c0_11 = arith.constant 0 : index
    %c0_12 = arith.constant 0 : index
    %25 = vector.load %arg6[%c0_11, %c0_12] : memref<1x300xf32, #tpu.memory_space<vmem>>, vector<1x300xf32>
    %26 = vector.broadcast %25 : vector<1x300xf32> to vector<16x300xf32>
    %27 = arith.mulf %24, %26 : vector<16x300xf32>
    %cst_13 = arith.constant dense<0.000000e+00> : vector<16xf32>
    %28 = vector.multi_reduction <add>, %27, %cst_13 [1] : vector<16x300xf32> to vector<16xf32>
    %29 = vector.shape_cast %28 : vector<16xf32> to vector<16x1xf32>
    %c0_14 = arith.constant 0 : index
    %30 = memref.load %arg7[%c0_14] : memref<1xf32, #tpu.memory_space<smem>>
    %31 = vector.broadcast %30 : f32 to vector<16x1xf32>
    %32 = arith.addf %29, %31 : vector<16x1xf32>
    %c0_15 = arith.constant 0 : index
    %c0_16 = arith.constant 0 : index
    %33 = vector.load %arg8[%c0_15, %c0_16] : memref<16x1xf32, #tpu.memory_space<vmem>>, vector<16x1xf32>
    tpu.vector_store %arg8[%c0_15, %c0_16], %32 {strides = array<i32>} : memref<16x1xf32, #tpu.memory_space<vmem>>, vector<16x1xf32>,
    return
  }
  func.func @transform_0(%arg0: i32) -> (i32, i32) {
    %c0_i32 = arith.constant 0 : i32
    %c0_i32_0 = arith.constant 0 : i32
    return %arg0, %c0_i32 : i32, i32
  }
  func.func @transform_1(%arg0: i32) -> (i32, i32) {
    %c0_i32 = arith.constant 0 : i32
    %c0_i32_0 = arith.constant 0 : i32
    %c0_i32_1 = arith.constant 0 : i32
    return %c0_i32, %c0_i32_0 : i32, i32
  }
  func.func @transform_2(%arg0: i32) -> (i32, i32) {
    %c0_i32 = arith.constant 0 : i32
    %c0_i32_0 = arith.constant 0 : i32
    %c0_i32_1 = arith.constant 0 : i32
    return %c0_i32, %c0_i32_0 : i32, i32
  }
  func.func @transform_3(%arg0: i32) -> (i32, i32) {
    %c0_i32 = arith.constant 0 : i32
    %c0_i32_0 = arith.constant 0 : i32
    %c0_i32_1 = arith.constant 0 : i32
    return %c0_i32, %c0_i32_0 : i32, i32
  }
  func.func @transform_4(%arg0: i32) -> (i32, i32) {
    %c0_i32 = arith.constant 0 : i32
    %c0_i32_0 = arith.constant 0 : i32
    %c0_i32_1 = arith.constant 0 : i32
    return %c0_i32, %c0_i32_0 : i32, i32
  }
  func.func @transform_5(%arg0: i32) -> (i32, i32) {
    %c0_i32 = arith.constant 0 : i32
    %c0_i32_0 = arith.constant 0 : i32
    %c0_i32_1 = arith.constant 0 : i32
    return %c0_i32, %c0_i32_0 : i32, i32
  }
  func.func @transform_6(%arg0: i32) -> i32 {
    %c0_i32 = arith.constant 0 : i32
    %c0_i32_0 = arith.constant 0 : i32
    return %c0_i32 : i32
  }
  func.func @transform_7(%arg0: i32) -> (i32, i32) {
    %c0_i32 = arith.constant 0 : i32
    %c0_i32_0 = arith.constant 0 : i32
    return %arg0, %c0_i32 : i32, i32
  }
}

</mosaic_0001>

<bundles_post_ra>
// kernel: tpu_custom_call.1
= control target key start
LH: loop header
LB: loop body
LE: loop exit
PB: predicated region body
PF: predicated region fallthrough
CT: control target
= control target key end

     0   :  { %s1477_s0 = inlined_call_operand.vmem [shape: f32[48,2], index: 0, kind: input, shape index: {}]   ;;  %s1478_s1 = inlined_call_operand.vmem [shape: f32[2,300], index: 1, kind: input, shape index: {}]   ;;  %s1479_s2 = inlined_call_operand.vmem [shape: f32[1,300], index: 2, kind: input, shape index: {}]   ;;  %s1480_s3 = inlined_call_operand.hbm [shape: f32[300,300], index: 3, kind: input, shape index: {}]   ;;  %s1481_s4 = inlined_call_operand.vmem [shape: f32[1,300], index: 4, kind: input, shape index: {}]   ;;  %s1482_s5 = inlined_call_operand.vmem [shape: f32[1,300], index: 5, kind: input, shape index: {}]   ;;  %s1483_s6 = inlined_call_operand.<no memory space> [shape: f32[1], index: 6, kind: input, shape index: {}]   ;;  %s1484_s7 = inlined_call_operand.vmem [shape: f32[48,1], index: 7, kind: output, shape index: {}]  }
   0x1   :  { %12 = sst [smem:[#allocation2]] %s1483_s6 }
   0x2   :  { %13 = vsyncpa [#allocation4], 0  ;;  %s1319_s26 = smov 0  }
   0x3 LB: > { %s987_s27 = sadd.s32 4294967295, %s1267_s26   ;;  %p989_p0 = scmp.ge.s32.totalorder %s1267_s26, 1  ;;  %s1267_s26 = sphi %s1319_s26, %s19_s26  }
   0x4   : > { %p202_p1 = scmp.lt.s32.totalorder %s1267_s26, 4  ;;  %s1269_s28 = smov [#allocation3]  }
   0x5   : > { %s220_s29 = sshll.u32 %s1269_s28, 4  ;;  %p1333_p3 = scmp.eq.s32.totalorder %s987_s27, 0  ;;  %s221_s29 = int_to_ptr.vmem [resolvable:$true] %s220_s29 }
   0x6   : > { %p1327_p2 = pnand %p989_p0, %p202_p1  ;;  %s1229_s11 = scalar_lea.hbm %s1480_s3, 14592 }
   0x7   : > { %s1489_s6 = scalar_select %p1333_p3, 1, 0 }
   0x8   : > { %s1488_s30 = scalar_select %p1327_p2, 1, 0 }
   0x9   : > { %p1204_p4 = pneg %p1327_p2  ;;  %p1230_p6 = scmp.ne.s32.totalorder %s1480_s3, %s1229_s11 }
   0xa   : > { %p1236_p10 = scmp.lt.u32.totalorder %s1229_s11, %s1480_s3 }
   0xb   : > { %p1341_p5 = pnand %p1333_p3, %p1204_p4 }
   0xd   : > { %p1231_p7 = pneg %p1341_p5 }
   0xf   : > { %p1232_p8 = pnand %p1231_p7, %p1230_p6 }
  0x11   : > { %p1233_p9 = pneg %p1232_p8 }
  0x13   : > { %p1238_p11 = pnand %p1236_p10, %p1233_p9 }
  0x15   : > { %1241 = shalt.err (!%p1238_p11)
}
  0x16   : > { %s1242_s16 = scalar_lea.vmem %s221_s29, 14592  ;;  %p1250_p1 = scmp.lt.s32.totalorder %s221_s29, %s221_s29 }
  0x17   : > { %p1243_p12 = scmp.ne.s32.totalorder %s221_s29, %s1242_s16  ;;  %p1251_p4 = scmp.lt.s32.totalorder %s1242_s16, %s1242_s16 }
  0x19   : > { %p1245_p13 = pnand %p1243_p12, %p1231_p7  ;;  %p1252_p3 = por %p1251_p4, %p1250_p1 }
  0x1b   : > { %p1246_p0 = pneg %p1245_p13 }
  0x1d   : > { %p1253_p2 = pnand %p1252_p3, %p1246_p0 }
  0x1f   : > { %1256 = shalt.err (!%p1253_p2)
}
  0x20   : > { %s1270_s17 = smov 384   ;;  %s1271_s18 = smov 24  }
  0x21   : > { %1207 = dma.hbm_to_vmem [thread:$0]  (!%p1341_p5), %s1480_s3, 14592, %s221_s29, [#allocation4], %s1270_s17, %s1270_s17, %s1271_s18  }
  0x22   : > { %p1491_p6 = scmp.ne.s32.totalorder %s1488_s30, 0 }
  0x23   : > { %p1492_p8 = scmp.ne.s32.totalorder (!%p1491_p6), %s1489_s6, 0 }
  0x24   : > { %254 = sbr.rel (%p1491_p6) target bundleno = 603 (0x25b), region = 48 }
  0x2b   : > { %1262 = dma.done.wait (%p1492_p8), [#allocation4], 14592  }
  0x2c   : > { %1264 = vsyncadd (%p1492_p8), [#allocation4], 4294952704  ;;  %s994_s21 = sshll.u32 %s987_s27, 1  ;;  %v1272_v0 = vmov 0   ;;  %v422_v3 = vld [vmem:[#allocation3 + $0x8] sm:$0xff]  ;;  %v425_v4 = vld [vmem:[#allocation3 + $0x20] sm:$0xff] }
  0x2d   : > { %1225 = vset.pattern.permute.xlu0 %v1272_v0  ;;  %p287_p2 = scmp.lt.s32.totalorder %s994_s21, 5  ;;  %1227 = vset.pattern.permute.xlu1 %v1272_v0  ;;  %v421_v5 = vld [vmem:[#allocation3] sm:$0xff]  ;;  %v424_v6 = vld [vmem:[#allocation3 + $0x18] sm:$0xff]  ;;  %v1068_v7 = vpack.c.bf16 %v425_v4, %v422_v3  ;;  %v431_v9 = vld [vmem:[#allocation3 + $0x50] sm:$0xff]  ;;  %v1273_v14 = vmov 1   ;;  %v1274_v23 = vmov 0.0  }
  0x2e   : > { %v428_v8 = vld [vmem:[#allocation3 + $0x38] sm:$0xff]  ;;  %v1070_v10 = vpack.c.bf16 %v424_v6, %v421_v5  ;;  %v427_v12 = vld [vmem:[#allocation3 + $0x30] sm:$0xff]  ;;  %v430_v13 = vld [vmem:[#allocation3 + $0x48] sm:$0xff]  ;;  %710 = vmatprep.mubr.f32.mxu1 %v1274_v23  ;;  %vm559_vm0 = vcmask 1043456   ;;  %vm1275_vm1 = vmmov 1   ;;  %vm552_vm3 = vcmask 359424  }
  0x2f   : > { %s1496_s21 = smov (!%p287_p2, %s994_s21), 5  ;;  %1069 = vmatprep.subr.bf16.mxu0 %v1068_v7  ;;  %v1072_v11 = vpack.c.bf16 %v431_v9, %v428_v8  ;;  %v434_v15 = vld [vmem:[#allocation3 + $0x68] sm:$0xff]  ;;  %v437_v16 = vld [vmem:[#allocation3 + $0x80] sm:$0xff]  ;;  %v1074_v17 = vpack.c.bf16 %v430_v13, %v427_v12  ;;  %v436_v20 = vld [vmem:[#allocation3 + $0x78] sm:$0xff]  ;;  %s912_s11 = sld [smem:[#allocation2]]  ;;  %vm916_vm4 = vcmask 7168  }
  0x30   : > { %s995_s22 = sshll.u32 %s1496_s21, 3  ;;  %1071 = vmatpush1.bf16.msra.mxu0 %v1070_v10  ;;  %v1076_v18 = vpack.c.bf16 %v437_v16, %v434_v15  ;;  %v433_v19 = vld [vmem:[#allocation3 + $0x60] sm:$0xff]  ;;  %v440_v21 = vld [vmem:[#allocation3 + $0x98] sm:$0xff]  ;;  %v443_v22 = vld [vmem:[#allocation3 + $0xb0] sm:$0xff] }
  0x31   : > { %s290_s25 = scalar_lea.vmem %s1477_s0, %s995_s22  ;;  %1073 = vmatprep.subr.bf16.mxu0 %v1072_v11  ;;  %v1078_v24 = vpack.c.bf16 %v436_v20, %v433_v19  ;;  %v1080_v25 = vpack.c.bf16 %v443_v22, %v440_v21  ;;  %v439_v26 = vld [vmem:[#allocation3 + $0x90] sm:$0xff]  ;;  %v442_v27 = vld [vmem:[#allocation3 + $0xa8] sm:$0xff]  ;;  %v449_v29 = vld [vmem:[#allocation3 + $0xe0] sm:$0xff]  ;;  %s296_s14 = scalar_lea.vmem %s1484_s7, %s995_s22 }
  0x32   : > { %v298_v1 = vld [vmem:[%s290_s25] sm:$0xff]  ;;  %v299_v2 = vld [vmem:[%s290_s25 + $0x8] sm:$0xff]  ;;  %v1082_v30 = vpack.c.bf16 %v442_v27, %v439_v26  ;;  %v448_v33 = vld [vmem:[#allocation3 + $0xd8] sm:$0xff] }
  0x33   : > { %303 = vperm.xlu0 %1225, %v298_v1   ;;  %308 = vperm.xlu1 %1227, %v299_v2   ;;  %v446_v28 = vld [vmem:[#allocation3 + $0xc8] sm:$0xff]  ;;  %v445_v32 = vld [vmem:[#allocation3 + $0xc0] sm:$0xff]  ;;  %v452_v34 = vld [vmem:[#allocation3 + $0xf8] sm:$0xff] }
  0x34   : > { %1075 = vmatpush1.bf16.msra.mxu0 %v1074_v17  ;;  %v1084_v31 = vpack.c.bf16 %v449_v29, %v446_v28  ;;  %v455_v35 = vld [vmem:[#allocation3 + $0x110] sm:$0xff]  ;;  %v518_v36 = vld [vmem:[#allocation3 + $0x308] sm:$0xff]  ;;  %v521_v37 = vld [vmem:[#allocation3 + $0x320] sm:$0xff]  ;;  %v1086_v38 = vpack.c.bf16 %v448_v33, %v445_v32 }
  0x35   : > { %1077 = vmatprep.subr.bf16.mxu0 %v1076_v18  ;;  %v451_v39 = vld [vmem:[#allocation3 + $0xf0] sm:$0xff]  ;;  %v1132_v40 = vpack.c.bf16 %v521_v37, %v518_v36  ;;  %v517_v41 = vld [vmem:[#allocation3 + $0x300] sm:$0xff]  ;;  %v520_v42 = vld [vmem:[#allocation3 + $0x318] sm:$0xff]  ;;  %v1088_v43 = vpack.c.bf16 %v455_v35, %v452_v34 }
  0x36   : > { %v454_v44 = vld [vmem:[#allocation3 + $0x108] sm:$0xff]  ;;  %v461_v46 = vld [vmem:[#allocation3 + $0x140] sm:$0xff]  ;;  %v1134_v47 = vpack.c.bf16 %v520_v42, %v517_v41  ;;  %v524_v48 = vld [vmem:[#allocation3 + $0x338] sm:$0xff] }
  0x37   : > { %1226 = vset.pattern.permute.xlu0 %v1273_v14  ;;  %1228 = vset.pattern.permute.xlu1 %v1273_v14  ;;  %v458_v45 = vld [vmem:[#allocation3 + $0x128] sm:$0xff]  ;;  %v527_v49 = vld [vmem:[#allocation3 + $0x350] sm:$0xff]  ;;  %v1090_v53 = vpack.c.bf16 %v454_v44, %v451_v39  ;;  %v457_v54 = vld [vmem:[#allocation3 + $0x120] sm:$0xff] }
  0x38   : > { %346 = vperm.xlu0 %1226, %v298_v1   ;;  %350 = vperm.xlu1 %1228, %v299_v2   ;;  %v523_v50 = vld [vmem:[#allocation3 + $0x330] sm:$0xff]  ;;  %v1136_v51 = vpack.c.bf16 %v527_v49, %v524_v48  ;;  %v526_v52 = vld [vmem:[#allocation3 + $0x348] sm:$0xff]  ;;  %v460_v55 = vld [vmem:[#allocation3 + $0x138] sm:$0xff]  ;;  %v1092_v58 = vpack.c.bf16 %v461_v46, %v458_v45 }
  0x39   : > { %1079 = vmatpush1.bf16.msra.mxu0 %v1078_v24  ;;  %1133 = vmatprep.subr.bf16.mxu1 %v1132_v40  ;;  %v1138_v56 = vpack.c.bf16 %v526_v52, %v523_v50  ;;  %v530_v57 = vld [vmem:[#allocation3 + $0x368] sm:$0xff]  ;;  %v533_v59 = vld [vmem:[#allocation3 + $0x380] sm:$0xf]  ;;  %vm1379_vm2 = vmpackc.low %vm559_vm0, %vm1275_vm1  ;;  %v1094_v4 = vpack.c.bf16 %v460_v55, %v457_v54 }
  0x3a   : > { %1081 = vmatprep.subr.bf16.mxu0 %v1080_v25  ;;  %1135 = vmatpush1.bf16.msra.mxu1 %v1134_v47  ;;  %v529_v61 = vld [vmem:[#allocation3 + $0x360] sm:$0xff]  ;;  %v464_v62 = vld [vmem:[#allocation3 + $0x158] sm:$0xff]  ;;  %v467_v63 = vld [vmem:[#allocation3 + $0x170] sm:$0xff]  ;;  %v1140_v0 = vpack.c.bf16 %v533_v59, %v530_v57 }
  0x3b   : > { %1137 = vmatprep.subr.bf16.mxu1 %v1136_v51  ;;  %v532_v1 = vld [vmem:[#allocation3 + $0x378] sm:$0xf]  ;;  %v471_v3 = vld [vmem:[#allocation3 + $0x190] sm:$0xff]  ;;  %v474_v5 = vld [vmem:[#allocation3 + $0x1a8] sm:$0xff]  ;;  %v1096_v6 = vpack.c.bf16 %v467_v63, %v464_v62 }
  0x3c   : > { %v1143_v2 = vpack.c.bf16 %v532_v1, %v529_v61  ;;  %v463_v7 = vld [vmem:[#allocation3 + $0x150] sm:$0xff]  ;;  %v466_v8 = vld [vmem:[#allocation3 + $0x168] sm:$0xff]  ;;  %v1146_v9 = vpack.c.bf16 %v474_v5, %v471_v3  ;;  %v473_v11 = vld [vmem:[#allocation3 + $0x1a0] sm:$0xff]  ;;  %v312_v61 = vlaneseq }
  0x3d   : > { %1083 = vmatpush1.bf16.msra.mxu0 %v1082_v30  ;;  %v470_v10 = vld [vmem:[#allocation3 + $0x188] sm:$0xff]  ;;  %v1098_v12 = vpack.c.bf16 %v466_v8, %v463_v7  ;;  %v469_v14 = vld [vmem:[#allocation3 + $0x180] sm:$0xff]  ;;  %v472_v15 = vld [vmem:[#allocation3 + $0x198] sm:$0xff] }
  0x3e   : > { %1085 = vmatprep.subr.bf16.mxu0 %v1084_v31  ;;  %1139 = vmatpush1.bf16.msra.mxu1 %v1138_v56  ;;  %v1100_v13 = vpack.c.bf16 %v473_v11, %v470_v10  ;;  %v476_v16 = vld [vmem:[#allocation3 + $0x1b8] sm:$0xff]  ;;  %v479_v17 = vld [vmem:[#allocation3 + $0x1d0] sm:$0xff]  ;;  %v1102_v18 = vpack.c.bf16 %v472_v15, %v469_v14  ;;  %v478_v21 = vld [vmem:[#allocation3 + $0x1c8] sm:$0xff]  ;;  %v313_v62 = vshrl.u32 %v312_v61, 7 }
  0x3f   : > { %1142 = vmatprep.subr.msk.bf16.mxu1 %vm1379_vm2, %v1140_v0  ;;  %v1104_v19 = vpack.c.bf16 %v479_v17, %v476_v16  ;;  %v475_v20 = vld [vmem:[#allocation3 + $0x1b0] sm:$0xff]  ;;  %v482_v22 = vld [vmem:[#allocation3 + $0x1e8] sm:$0xff]  ;;  %v485_v24 = vld [vmem:[#allocation3 + $0x200] sm:$0xff] }
  0x40   : > { %v1106_v25 = vpack.c.bf16 %v478_v21, %v475_v20  ;;  %v1108_v26 = vpack.c.bf16 %v485_v24, %v482_v22  ;;  %v481_v27 = vld [vmem:[#allocation3 + $0x1e0] sm:$0xff]  ;;  %v484_v28 = vld [vmem:[#allocation3 + $0x1f8] sm:$0xff]  ;;  %v491_v30 = vld [vmem:[#allocation3 + $0x230] sm:$0xff]  ;;  %v1387_v63 = vsub.s32 0, %v313_v62  ;;  %v1392_v1 = vsub.s32 2, %v313_v62 }
  0x41   : > { %1087 = vmatpush1.bf16.msra.mxu0 %v1086_v38  ;;  %v488_v29 = vld [vmem:[#allocation3 + $0x218] sm:$0xff]  ;;  %v1110_v31 = vpack.c.bf16 %v484_v28, %v481_v27  ;;  %v487_v33 = vld [vmem:[#allocation3 + $0x210] sm:$0xff]  ;;  %v490_v34 = vld [vmem:[#allocation3 + $0x228] sm:$0xff]  ;;  %v1394_v3 = vsub.s32 1, %v313_v62  ;;  %v363_v5 = vsub.s32 5, %v313_v62 }
  0x42   : > { %1089 = vmatprep.subr.bf16.mxu0 %v1088_v43  ;;  %1145 = vmatpush1.bf16.msk.msra.mxu1 %vm1379_vm2, %v1143_v2  ;;  %v1112_v32 = vpack.c.bf16 %v491_v30, %v488_v29  ;;  %v494_v35 = vld [vmem:[#allocation3 + $0x248] sm:$0xff]  ;;  %v497_v36 = vld [vmem:[#allocation3 + $0x260] sm:$0xff]  ;;  %v1114_v37 = vpack.c.bf16 %v490_v34, %v487_v33  ;;  %v496_v40 = vld [vmem:[#allocation3 + $0x258] sm:$0xff]  ;;  %v322_v2 = vsub.s32 4, %v313_v62 }
  0x43   : > { %1147 = vmatprep.subr.bf16.mxu1 %v1146_v9  ;;  %v1116_v38 = vpack.c.bf16 %v497_v36, %v494_v35  ;;  %v493_v39 = vld [vmem:[#allocation3 + $0x240] sm:$0xff]  ;;  %v500_v41 = vld [vmem:[#allocation3 + $0x278] sm:$0xff]  ;;  %v503_v42 = vld [vmem:[#allocation3 + $0x290] sm:$0xff] }
  0x44   : > { %v1118_v43 = vpack.c.bf16 %v496_v40, %v493_v39  ;;  %v1120_v44 = vpack.c.bf16 %v503_v42, %v500_v41  ;;  %v499_v45 = vld [vmem:[#allocation3 + $0x270] sm:$0xff]  ;;  %v502_v46 = vld [vmem:[#allocation3 + $0x288] sm:$0xff]  ;;  %v509_v48 = vld [vmem:[#allocation3 + $0x2c0] sm:$0xff] }
  0x45   : > { %1091 = vmatpush1.bf16.msra.mxu0 %v1090_v53  ;;  %v506_v47 = vld [vmem:[#allocation3 + $0x2a8] sm:$0xff]  ;;  %v1122_v49 = vpack.c.bf16 %v502_v46, %v499_v45  ;;  %v505_v51 = vld [vmem:[#allocation3 + $0x2a0] sm:$0xff]  ;;  %v508_v52 = vld [vmem:[#allocation3 + $0x2b8] sm:$0xff] }
  0x46   : > { %1093 = vmatprep.subr.bf16.mxu0 %v1092_v58  ;;  %v1124_v50 = vpack.c.bf16 %v509_v48, %v506_v47  ;;  %v512_v53 = vld [vmem:[#allocation3 + $0x2d8] sm:$0xff]  ;;  %v515_v54 = vld [vmem:[#allocation3 + $0x2f0] sm:$0xff]  ;;  %v1126_v55 = vpack.c.bf16 %v508_v52, %v505_v51  ;;  %v514_v58 = vld [vmem:[#allocation3 + $0x2e8] sm:$0xff] }
  0x47   : > { %v1128_v56 = vpack.c.bf16 %v515_v54, %v512_v53  ;;  %v511_v57 = vld [vmem:[#allocation3 + $0x2d0] sm:$0xff]  ;;  %v300_v0 = vld [vmem:[%s1478_s1] sm:$0x3f]  ;;  %v480_v46 = vld [vmem:[#allocation3 + $0x1d8] sm:$0xff] }
  0x48   : > { %v1130_v59 = vpack.c.bf16 %v514_v58, %v511_v57  ;;  %v319_v7 = vrot.slane %v300_v0, %v1392_v1  ;;  %v323_v8 = vrot.slane %v300_v0, %v322_v2  ;;  %v356_v9 = vrot.slane %v300_v0, %v1394_v3  ;;  %v392_v15 = vld [vmem:[%s1479_s2] sm:$0x7]  ;;  %v423_v39 = vld [vmem:[#allocation3 + $0x10] sm:$0xff]  ;;  %v432_v61 = vld [vmem:[#allocation3 + $0x58] sm:$0xff] }
  0x49   : > { %1095 = vmatpush1.bf16.msra.mxu0 %v1094_v4  ;;  %v359_v4 = vsub.s32 3, %v313_v62  ;;  %v364_v11 = vrot.slane %v300_v0, %v363_v5  ;;  %v401_v21 = vrot.slane %v392_v15, %v1394_v3  ;;  %v477_v45 = vld [vmem:[#allocation3 + $0x1c0] sm:$0xff]  ;;  %v486_v2 = vld [vmem:[#allocation3 + $0x208] sm:$0xff] }
  0x4a   : > { %1097 = vmatprep.subr.bf16.mxu0 %v1096_v6  ;;  %v315_v6 = vrot.slane %v300_v0, %v1387_v63  ;;  %v334_v16 = vrot.slane %v319_v7, %v1387_v63  ;;  %v338_v17 = vrot.slane %v323_v8, %v1387_v63  ;;  %v1150_v53 = vpack.c.bf16 %v480_v46, %v477_v45  ;;  %v435_v8 = vld [vmem:[#allocation3 + $0x70] sm:$0xff]  ;;  %v525_v45 = vld [vmem:[#allocation3 + $0x340] sm:$0xff]  ;;  %v528_v46 = vld [vmem:[#allocation3 + $0x358] sm:$0xff] }
  0x4b   : > { %v360_v10 = vrot.slane %v300_v0, %v359_v4  ;;  %v379_v20 = vrot.slane %v364_v11, %v1394_v3  ;;  %v483_v0 = vld [vmem:[#allocation3 + $0x1f0] sm:$0xff]  ;;  %v489_v11 = vld [vmem:[#allocation3 + $0x220] sm:$0xff] }
  0x4c   : > { %v1154_v7 = vpack.c.bf16 %v486_v2, %v483_v0 }
  0x4d   : > { %1099 = vmatpush1.bf16.msra.mxu0 %v1098_v12  ;;  %v330_v12 = vrot.slane %v315_v6, %v1387_v63 }
  0x4e   : > { %1101 = vmatprep.subr.bf16.mxu0 %v1100_v13 }
  0x51   : > { %1103 = vmatpush1.bf16.msra.mxu0 %v1102_v18  ;;  %v371_v18 = vrot.slane %v356_v9, %v1394_v3  ;;  %v438_v9 = vld [vmem:[#allocation3 + $0x88] sm:$0xff] }
  0x52   : > { %1105 = vmatprep.subr.bf16.mxu0 %v1104_v19  ;;  %v375_v19 = vrot.slane %v360_v10, %v1394_v3 }
  0x55   : > { %1107 = vmatpush1.bf16.msra.mxu0 %v1106_v25  ;;  %v405_v25 = vrot.slane %v392_v15, %v1392_v1 }
  0x56   : > { %1109 = vmatprep.subr.bf16.mxu0 %v1108_v26  ;;  %v397_v26 = vrot.slane %v392_v15, %v1387_v63  ;;  %v444_v15 = vld [vmem:[#allocation3 + $0xb8] sm:$0xff] }
  0x59   : > { %1111 = vmatpush1.bf16.msra.mxu0 %v1110_v31 }
  0x5a   : > { %1113 = vmatprep.subr.bf16.mxu0 %v1112_v32 }
  0x5d   : > { %1115 = vmatpush1.bf16.msra.mxu0 %v1114_v37 }
  0x5e   : > { %1117 = vmatprep.subr.bf16.mxu0 %v1116_v38 }
  0x61   : > { %1119 = vmatpush1.bf16.msra.mxu0 %v1118_v43 }
  0x62   : > { %1121 = vmatprep.subr.bf16.mxu0 %v1120_v44  ;;  %v426_v44 = vld [vmem:[#allocation3 + $0x28] sm:$0xff] }
  0x63   : > { %v1148_v52 = vpack.c.bf16 %v426_v44, %v423_v39  ;;  %v465_v39 = vld [vmem:[#allocation3 + $0x160] sm:$0xff] }
  0x65   : > { %1123 = vmatpush1.bf16.msra.mxu0 %v1122_v49 }
  0x66   : > { %1125 = vmatprep.subr.bf16.mxu0 %v1124_v50 }
  0x69   : > { %1127 = vmatpush1.bf16.msra.mxu0 %v1126_v55 }
  0x6a   : > { %1129 = vmatprep.subr.bf16.mxu0 %v1128_v56 }
  0x6d   : > { %1131 = vmatpush1.bf16.msra.mxu0 %v1130_v59  ;;  %v429_v59 = vld [vmem:[#allocation3 + $0x40] sm:$0xff] }
  0x6e   : > { %v1152_v6 = vpack.c.bf16 %v432_v61, %v429_v59 }
  0xb2   : > { %v304_v13 = vpop.permute.xlu0 %303  ;;  %v309_v14 = vpop.permute.xlu1 %308 }
  0xb3   : > { %v339_v22 = vmul.f32 %v330_v12, %v304_v13  ;;  %v342_v24 = vmul.f32 %v330_v12, %v309_v14  ;;  %v340_v27 = vmul.f32 %v334_v16, %v304_v13  ;;  %v341_v28 = vmul.f32 %v338_v17, %v304_v13  ;;  %v492_v12 = vld [vmem:[#allocation3 + $0x238] sm:$0xff] }
  0xb4   : > { %v343_v29 = vmul.f32 %v334_v16, %v309_v14  ;;  %v344_v30 = vmul.f32 %v338_v17, %v309_v14  ;;  %v1156_v13 = vpack.c.bf16 %v438_v9, %v435_v8  ;;  %v441_v14 = vld [vmem:[#allocation3 + $0xa0] sm:$0xff]  ;;  %v495_v16 = vld [vmem:[#allocation3 + $0x250] sm:$0xff]  ;;  %v498_v17 = vld [vmem:[#allocation3 + $0x268] sm:$0xff] }
  0xb7   : > { %v347_v31 = vpop.permute.xlu0 %346  ;;  %v351_v32 = vpop.permute.xlu1 %350 }
  0xb8   : > { %v380_v33 = vmul.f32 %v371_v18, %v347_v31  ;;  %v381_v34 = vmul.f32 %v375_v19, %v347_v31  ;;  %v382_v35 = vmul.f32 %v379_v20, %v347_v31  ;;  %v383_v36 = vmul.f32 %v371_v18, %v351_v32 }
  0xb9   : > { %v384_v37 = vmul.f32 %v375_v19, %v351_v32  ;;  %v385_v38 = vmul.f32 %v379_v20, %v351_v32  ;;  %v1160_v18 = vpack.c.bf16 %v444_v15, %v441_v14  ;;  %v1162_v19 = vpack.c.bf16 %v498_v17, %v495_v16  ;;  %v447_v20 = vld [vmem:[#allocation3 + $0xd0] sm:$0xff] }
  0xba   : > { %v386_v40 = vadd.f32 %v380_v33, %v339_v22  ;;  %v388_v41 = vadd.f32 %v382_v35, %v341_v28  ;;  %v389_v42 = vadd.f32 %v383_v36, %v342_v24  ;;  %v387_v43 = vadd.f32 %v381_v34, %v340_v27  ;;  %v501_v22 = vld [vmem:[#allocation3 + $0x280] sm:$0xff]  ;;  %v504_v24 = vld [vmem:[#allocation3 + $0x298] sm:$0xff]  ;;  %v459_v33 = vld [vmem:[#allocation3 + $0x130] sm:$0xff] }
  0xbb   : > { %v390_v47 = vadd.f32 %v384_v37, %v343_v29  ;;  %v391_v48 = vadd.f32 %v385_v38, %v344_v30  ;;  %v453_v27 = vld [vmem:[#allocation3 + $0x100] sm:$0xff]  ;;  %v456_v28 = vld [vmem:[#allocation3 + $0x118] sm:$0xff]  ;;  %v507_v29 = vld [vmem:[#allocation3 + $0x2b0] sm:$0xff] }
  0xbc   : > { %v410_v49 = vadd.f32 %v401_v21, %v387_v43  ;;  %v1411_v50 = vadd.f32 %v405_v25, %v388_v41  ;;  %v1413_v51 = vadd.f32 %v397_v26, %v386_v40  ;;  %v1421_v62 = vadd.f32 %v397_v26, %v389_v42  ;;  %v510_v30 = vld [vmem:[#allocation3 + $0x2c8] sm:$0xff]  ;;  %v513_v35 = vld [vmem:[#allocation3 + $0x2e0] sm:$0xff]  ;;  %v516_v36 = vld [vmem:[#allocation3 + $0x2f8] sm:$0xff] }
  0xbd   : > { %v1415_v54 = vadd.f32 %v405_v25, %v391_v48  ;;  %v1417_v55 = vadd.f32 %v401_v21, %v390_v47  ;;  %v450_v21 = vld [vmem:[#allocation3 + $0xe8] sm:$0xff]  ;;  %v1166_v26 = vpack.c.bf16 %v504_v24, %v501_v22  ;;  %v1168_v31 = vpack.c.bf16 %v456_v28, %v453_v27  ;;  %v468_v40 = vld [vmem:[#allocation3 + $0x178] sm:$0xff]  ;;  %v519_v41 = vld [vmem:[#allocation3 + $0x310] sm:$0xff] }
  0xbe   : > { %v416_v56 = vmax.f32 %v410_v49, 0.0  ;;  %v417_v57 = vmax.f32 %v1411_v50, 0.0  ;;  %v415_v58 = vmax.f32 %v1413_v51, 0.0  ;;  %v418_v10 = vmax.f32 %v1421_v62, 0.0  ;;  %v462_v34 = vld [vmem:[#allocation3 + $0x148] sm:$0xff]  ;;  %v531_v48 = vld [vmem:[#allocation3 + $0x370] sm:$0xff] }
  0xbf   : > { %v419_v4 = vmax.f32 %v1417_v55, 0.0  ;;  %v420_v5 = vmax.f32 %v1415_v54, 0.0  ;;  %v1164_v25 = vpack.c.bf16 %v450_v21, %v447_v20  ;;  %v1170_v32 = vpack.c.bf16 %v510_v30, %v507_v29  ;;  %v522_v42 = vld [vmem:[#allocation3 + $0x328] sm:$0xff]  ;;  %v535_v51 = vld [vmem:[%s1481_s4] sm:$0x7] }
  0xc0   : > { %633 = vmatprep.mubr.f32.mxu0 %v416_v56  ;;  %1000 = vmatmul.mubr.msk.f32.vlgmr.msra.gmra.mrb[0].mxu1 %vm552_vm3, %v417_v57  ;;  %v1172_v37 = vpack.c.bf16 %v462_v34, %v459_v33  ;;  %v1174_v38 = vpack.c.bf16 %v516_v36, %v513_v35  ;;  %v1176_v43 = vpack.c.bf16 %v468_v40, %v465_v39  ;;  %v534_v49 = vld [vmem:[#allocation3 + $0x388] sm:$0xf] }
  0xc1   : > { %1149 = vmatpush3.bf16.msra.mxu1 %v1148_v52  ;;  %634 = vmatmul.mubr.f32.vlgmr.msra.gmra.mrb[0].mxu0 %v415_v58  ;;  %v1178_v44 = vpack.c.bf16 %v522_v42, %v519_v41  ;;  %v1182_v47 = vpack.c.bf16 %v528_v46, %v525_v45  ;;  %v1186_v52 = vpack.c.bf16 %v534_v49, %v531_v48  ;;  %v913_v42 = vstv %s912_s11 }
  0xc2   : > { %716 = vmatprep.mubr.f32.mxu1 %v1274_v23  ;;  %1151 = vmatprep.subr.bf16.mxu1 %v1150_v53  ;;  %v1158_v23 = vpack.c.bf16 %v492_v12, %v489_v11  ;;  %v540_v53 = vrot.slane %v535_v51, %v1387_v63  ;;  %v544_v50 = vrot.slane %v535_v51, %v1394_v3 }
  0xc3   : > { %639 = vmatprep.mubr.f32.mxu0 %v419_v4 }
  0xc4   : > { %1001 = vmatmul.mubr.msk.f32.gmra.mrb[2].mxu1 %vm552_vm3, %v420_v5 }
  0xc5   : > { %1153 = vmatpush3.bf16.msra.mxu1 %v1152_v6  ;;  %787 = vmatprep.mubr.f32.mxu1 %v416_v56 }
  0xc6   : > { %1155 = vmatprep.subr.bf16.mxu1 %v1154_v7  ;;  %640 = vmatmul.mubr.f32.gmra.mrb[2].mxu0 %v418_v10 }
  0xc9   : > { %1157 = vmatpush3.bf16.msra.mxu1 %v1156_v13 }
  0xca   : > { %1159 = vmatprep.subr.bf16.mxu1 %v1158_v23 }
  0xcd   : > { %1161 = vmatpush3.bf16.msra.mxu1 %v1160_v18 }
  0xce   : > { %1163 = vmatprep.subr.bf16.mxu1 %v1162_v19 }
  0xd1   : > { %1165 = vmatpush3.bf16.msra.mxu1 %v1164_v25 }
  0xd2   : > { %1167 = vmatprep.subr.bf16.mxu1 %v1166_v26  ;;  %v548_v26 = vrot.slane %v535_v51, %v1392_v1 }
  0xd5   : > { %1169 = vmatpush3.bf16.msra.mxu1 %v1168_v31 }
  0xd6   : > { %1171 = vmatprep.subr.bf16.mxu1 %v1170_v32 }
  0xd9   : > { %1173 = vmatpush3.bf16.msra.mxu1 %v1172_v37 }
  0xda   : > { %1175 = vmatprep.subr.bf16.mxu1 %v1174_v38 }
  0xdd   : > { %1177 = vmatpush3.bf16.msra.mxu1 %v1176_v43 }
  0xde   : > { %1179 = vmatprep.subr.bf16.mxu1 %v1178_v44 }
  0xe0   : > { %788 = vmatmul.mubr.f32.vlgmr.msra.gmra.mrb[4].mxu1 %v415_v58 }
  0xe1   : > { %792 = vmatprep.mubr.f32.mxu1 %v419_v4  ;;  %1181 = vmatpush3.bf16.msra.mxu1 %v1178_v44 }
  0xe2   : > { %1183 = vmatprep.subr.bf16.mxu1 %v1182_v47 }
  0xe4   : > { %793 = vmatmul.mubr.f32.gmra.mrb[6].mxu1 %v418_v10 }
  0xe5   : > { %1185 = vmatpush3.bf16.msra.mxu1 %v1182_v47  ;;  %1065 = vmatprep.mubr.msk.f32.mxu1 %vm552_vm3, %v417_v57  ;;  %v879_v57 = vld [vmem:[%s1482_s5] sm:$0x7] }
  0xe6   : > { %1188 = vmatprep.subr.msk.bf16.mxu1 %vm1379_vm2, %v1186_v52  ;;  %v884_v62 = vrot.slane %v879_v57, %v1387_v63  ;;  %v888_v4 = vrot.slane %v879_v57, %v1394_v3  ;;  %v892_v31 = vrot.slane %v879_v57, %v1392_v1 }
  0xe9   : > { %1191 = vmatpush3.bf16.msk.msra.mxu1 %vm1379_vm2, %v1186_v52 }
  0xec   : > { %1066 = vmatmul.mubr.msk.f32.vlgmr.msra.gmra.mrb[8].mxu1 %vm552_vm3, %v420_v5 }
 0x193   : > { %v712_v55 = vpop.f32.mrb[0].mxu1 }
 0x194   : > { %v635_v56 = vpop.f32.mrb[0].mxu0  ;;  %v714_v60 = vpop.f32.mrb[1].mxu1 }
 0x195   : > { %v636_v58 = vadd.f32 %v635_v56, %v540_v53  ;;  %v637_v59 = vpop.f32.mrb[1].mxu0 }
 0x196   : > { %v638_v54 = vadd.f32 %v637_v59, %v544_v50 }
 0x197   : > { %v713_v61 = vadd.f32 %v712_v55, %v636_v58  ;;  %v718_v0 = vpop.f32.mrb[2].mxu1 }
 0x198   : > { %v715_v2 = vadd.f32 %v714_v60, %v638_v54  ;;  %v720_v5 = vpop.f32.mrb[3].mxu1 }
 0x199   : > { %v873_v6 = vmax.f32 %v713_v61, 0.0  ;;  %v641_v7 = vpop.f32.mrb[2].mxu0 }
 0x19a   : > { %v874_v8 = vmax.f32 %v715_v2, 0.0  ;;  %v642_v9 = vadd.f32 %v641_v7, %v540_v53  ;;  %v643_v10 = vpop.f32.mrb[3].mxu0 }
 0x19b   : > { %v896_v11 = vmul.f32 %v884_v62, %v873_v6  ;;  %v644_v12 = vadd.f32 %v643_v10, %v544_v50 }
 0x19c   : > { %v897_v13 = vmul.f32 %v888_v4, %v874_v8  ;;  %v719_v23 = vadd.f32 %v718_v0, %v642_v9 }
 0x19d   : > { %v721_v14 = vadd.f32 %v720_v5, %v644_v12 }
 0x19e   : > { %v876_v15 = vmax.f32 %v719_v23, 0.0  ;;  %v902_v16 = vadd.f32 %v897_v13, %v896_v11 }
 0x19f   : > { %v877_v17 = vmax.f32 %v721_v14, 0.0 }
 0x1a0   : > { %v899_v18 = vmul.f32 %v884_v62, %v876_v15 }
 0x1a1   : > { %v900_v63 = vmul.f32 %v888_v4, %v877_v17 }
 0x1a3   : > { %v907_v19 = vadd.f32 %v900_v63, %v899_v18 }
 0x1b3   : > { %v1039_v20 = vpop.f32.mrb[4].mxu1 }
 0x1b4   : > { %v1040_v21 = vpop.f32.mrb[5].mxu1 }
 0x1b5   : > { %v1041_v3 = vadd.f32 %v1040_v21, %v1039_v20 }
 0x1b7   : > { %v1042_v22 = vpop.f32.mrb[6].mxu1  ;;  %v790_v29 = vadd.f32 %v1041_v3, %v548_v26 }
 0x1b8   : > { %v1043_v24 = vpop.f32.mrb[7].mxu1 }
 0x1b9   : > { %v1044_v25 = vadd.f32 %v1043_v24, %v1042_v22 }
 0x1bb   : > { %v795_v27 = vadd.f32 %v1044_v25, %v548_v26 }
 0x1bf   : > { %v1067_v28 = vpop.f32.mrb[8].mxu1 }
 0x1c0   : > { %v870_v30 = vadd.f32 %v1067_v28, %v795_v27  ;;  %v864_v32 = vpop.f32.mrb[9].mxu1 }
 0x1c1   : > { %v865_v33 = vadd.f32 %v864_v32, %v790_v29 }
 0x1c2   : > { %v878_v34 = vmax.f32 %v870_v30, 0.0 }
 0x1c3   : > { %v875_v35 = vmax.f32 %v865_v33, 0.0 }
 0x1c4   : > { %v901_v36 = vmul.f32 %v892_v31, %v878_v34 }
 0x1c5   : > { %v898_v37 = vmul.f32 %v892_v31, %v875_v35 }
 0x1c6   : > { %v908_v38 = vsel %vm552_vm3, %v901_v36, 0.0 }
 0x1c7   : > { %v909_v39 = vadd.f32 %v908_v38, %v907_v19  ;;  %v903_v40 = vsel %vm552_vm3, %v898_v37, 0.0 }
 0x1c8   : > { %v904_v41 = vadd.f32 %v903_v40, %v902_v16 }
 0x1c9   : > { %910 = vadd.xlane.f32.xlu0 %v909_v39 }
 0x1ca   : > { %905 = vadd.xlane.f32.xlu1 %v904_v41 }
 0x256   : > { %v911_v43 = vpop.xlane.xlu0 %910 }
 0x257   : > { %v906_v1 = vpop.xlane.xlu1 %905  ;;  %v915_v45 = vadd.f32 %v913_v42, %v911_v43 }
 0x258   : > { %v914_v44 = vadd.f32 %v913_v42, %v906_v1 }
 0x259   : > { %918 = vst.msk [vmem:[%s296_s14 + $0x8] sm:$0xff] %vm916_vm4, %v915_v45 }
 0x25a   : > { %917 = vst.msk [vmem:[%s296_s14] sm:$0xff] %vm916_vm4, %v914_v44 }
 0x25b PF: > { %s19_s26 = sadd.s32 1, %s1267_s26  }
 0x25c   : > { %p16_p3 = scmp.ge.s32.totalorder %s19_s26, 5  }
 0x25e   :  { %18 = sbr.rel (!%p16_p3) target bundleno = 3 (0x3), region = 83 }
 0x265   :  { %941 = vsyncpa [#allocation4], 1 }
 0x266   :  { %943 = vsyncpa [#allocation4 + $0x1], 1 }

</bundles_post_ra>
